<compile_context>
chip_gen: v7x
topology: tpu7x:2x2x1
jax: 0.10.0
libtpu: 0.0.40
codegen_flags: <defaults>
</compile_context>

<pallas_src>
import math
import functools

import jax
import jax.numpy as jnp
from jax import lax
from jax.experimental import pallas as pl
from jax.experimental.pallas import tpu as pltpu


_KV_PAD = 128                  # pad key/value length to a lane-width multiple
_SUBLANE = 8
_TILE_CANDIDATES = (1024, 512, 256, 128, 64, 32, 16, 8)


def _round_up(n, m):
    return ((n + m - 1) // m) * m


def _vmem_limit_bytes():
    """Generation-aware scoped-VMEM budget (v5e/v6e: 128 MiB phys, v7x: 64 MiB)."""
    try:
        phys = int(pltpu.get_tpu_info().vmem_capacity_bytes)
        return int(min(phys * 0.65, 96 * 1024 * 1024))
    except Exception:
        return 48 * 1024 * 1024        # safe on every generation / interpret mode


def _pick_kv_tile(nkv_pad, D, w_bytes, y_bytes, kv_bytes, vmem_budget, single_buf_w):
    """Largest KV row tile whose pipeline buffers fit the VMEM budget."""
    w_fixed = D * (2 * D) * w_bytes * (1 if single_buf_w else 2)
    budget = 0.8 * vmem_budget
    for t in _TILE_CANDIDATES:
        if t > nkv_pad or nkv_pad % t != 0:
            continue
        per = t * (2 * D * y_bytes            # y tile, double buffered
                   + 2 * 2 * D * kv_bytes     # k and v output tiles, double buffered
                   + 2 * D * 4)               # f32 kv intermediate inside the kernel
        if w_fixed + per <= budget:
            return t
    return min(_KV_PAD, nkv_pad)


def _pick_q_tile(nq, D, nkv_pad, w_bytes, x_bytes, o_bytes, kv_bytes,
                 vmem_budget, single_buf_w):
    """Largest query row tile whose pipeline buffers + live f32 slabs fit VMEM."""
    cap = max(_SUBLANE, _round_up(nq, _SUBLANE))
    fixed = D * D * w_bytes * (1 if single_buf_w else 2)      # wq
    fixed += 2 * 2 * nkv_pad * D * kv_bytes                   # K and V blocks (x2 bufs)
    budget = 0.8 * vmem_budget
    for t in _TILE_CANDIDATES:
        if t > cap:
            continue
        per = t * (2 * D * x_bytes            # x tile (double buffered)
                   + 2 * D * o_bytes          # out tile (double buffered)
                   + 4 * D                    # f32 q slab
                   + 2 * 4 * nkv_pad)         # f32 scores + probs for one head
        if fixed + per <= budget:
            return t
    return _SUBLANE


def _blocked_weight(w, n_heads, head_dim):
    """PyTorch (out, in) weight -> (in, out) with head-BLOCKED output channels.

    einops 'bs n (d h) -> bs h n d' means head h owns output channels {d*H + h}.
    We permute so that after `tokens @ W`, head h owns the CONTIGUOUS lane slice
    [h*dh : (h+1)*dh] (cheap static slicing in the kernel).
    """
    d_out, d_in = w.shape
    w = w.reshape(head_dim, n_heads, d_in)        # [d, h, in]  (out ch = d*H + h)
    w = jnp.transpose(w, (1, 0, 2))               # [h, d, in]
    w = w.reshape(d_out, d_in)                    # row = h*dh + d
    return jnp.transpose(w)                       # (in, h*dh + d)


# --------------------------------------------------------------------------------------
# Kernel 1: kv projection.  Grid (B, Nkv_pad_tiles).  One full-width (tkv, D) x (D, 2D)
# matmul per step; k / v written as two lane-dense (tkv, D) slabs in the compute dtype.
# --------------------------------------------------------------------------------------
def _kv_proj_kernel(y_ref, wkv_ref, k_ref, v_ref, *, embed_dim, compute_dtype):
    y = y_ref[0].astype(compute_dtype)                                   # (tkv, D)
    kv = jnp.dot(y, wkv_ref[...], preferred_element_type=jnp.float32)    # (tkv, 2D)
    k_ref[0] = kv[:, :embed_dim].astype(k_ref.dtype)
    v_ref[0] = kv[:, embed_dim:].astype(v_ref.dtype)


# --------------------------------------------------------------------------------------
# Kernel 2: q projection + multi-head attention.  Grid (B, Nq_pad_tiles).
# q = x_tile @ Wq is one full-width (tq, D) x (D, D) matmul; heads are processed as
# contiguous dh-lane slices and written directly into their lane slice of the output
# block (single lane-dense (tq, D) writeback DMA).
# --------------------------------------------------------------------------------------
def _attn_kernel(x_ref, wq_ref, k_ref, v_ref, o_ref, *,
                 n_heads, head_dim, scale, compute_dtype,
                 kv_valid, kv_total, approx_recip):
    x = x_ref[0].astype(compute_dtype)                                   # (tq, D)
    q = jnp.dot(x, wq_ref[...], preferred_element_type=jnp.float32)      # (tq, D) f32
    q = (q * scale).astype(compute_dtype)   # fold 1/sqrt(dh) into q once; one cast for all heads

    k = k_ref[0]                                                         # (kv_total, D)
    v = v_ref[0]                                                         # (kv_total, D)

    score_bias = None
    if kv_valid != kv_total:                 # static: mask zero-padded key columns
        col = lax.broadcasted_iota(jnp.int32, (1, kv_total), 1)
        score_bias = jnp.where(col < kv_valid, 0.0, -1e30).astype(jnp.float32)

    # TODO(synk): for H >= 8 on v6e/v7x, switch this unrolled head loop to a single
    # head-batched lax.dot_general pair so per-head MXU passes pipeline back-to-back.
    for h in range(n_heads):                                             # trace-time unroll
        lo = h * head_dim
        hi = lo + head_dim
        qh = q[:, lo:hi]                                                 # (tq, dh)
        kh = k[:, lo:hi]                                                 # (kv_total, dh)
        vh = v[:, lo:hi]                                                 # (kv_total, dh)

        # scores: (tq, kv_total), contraction over dh, f32 accumulation
        s = lax.dot_general(qh, kh, (((1,), (1,)), ((), ())),
                            preferred_element_type=jnp.float32)
        if score_bias is not None:
            s = s + score_bias

        # numerically-stable softmax over keys (f32)
        s = s - jnp.max(s, axis=-1, keepdims=True)
        p = jnp.exp(s)
        p = p * pl.reciprocal(jnp.sum(p, axis=-1, keepdims=True), approx=approx_recip)

        oh = jnp.dot(p.astype(compute_dtype), vh,
                     preferred_element_type=jnp.float32)                 # (tq, dh)
        o_ref[0, :, lo:hi] = oh.astype(o_ref.dtype)                      # direct lane-slice store


def cross_attention(x, y, wq, wkv, n_heads, *, mxu_dtype=None,
                    single_buffer_weights=True, approx_softmax_recip=False):
    """Pallas implementation of CrossAttention.forward (inference path, no dropout).

    x:   (B, Nq, D)   query-side tokens
    y:   (B, Nkv, D)  key/value-side tokens
    wq:  (D, D)       q_linear weight, PyTorch (out, in) convention, no bias
    wkv: (2D, D)      kv_linear weight, PyTorch (out, in) convention, no bias
    mxu_dtype: optional narrow dtype (e.g. jnp.bfloat16) used for ALL MXU operands
               (projections, QK^T, PV); softmax math and accumulation stay f32.
    """
    B, Nq, D = x.shape
    By, Nkv, Dy = y.shape
    assert By == B and Dy == D
    H = n_heads
    assert D % H == 0
    dh = D // H
    scale = 1.0 / math.sqrt(dh)              # PyTorch SDPA default scale = 1/sqrt(E)

    compute_dtype = jnp.dtype(mxu_dtype) if mxu_dtype is not None else jnp.dtype(x.dtype)

    # Head-blocked (in, out) weights, cast once in the wrapper to the MXU dtype.
    wq_b = _blocked_weight(wq, H, dh).astype(compute_dtype)                   # (D, D)
    wk_b = _blocked_weight(wkv[:D], H, dh)
    wv_b = _blocked_weight(wkv[D:], H, dh)
    wkv_b = jnp.concatenate([wk_b, wv_b], axis=1).astype(compute_dtype)       # (D, 2D)

    vmem_limit = _vmem_limit_bytes()
    cparams = pltpu.CompilerParams(
        dimension_semantics=("parallel", "parallel"),
        vmem_limit_bytes=vmem_limit)

    w_bytes = jnp.dtype(compute_dtype).itemsize
    act_bytes = jnp.dtype(x.dtype).itemsize
    kv_bytes = w_bytes                     # K/V stored in the compute dtype

    # Pad KV length to a multiple of 128: scores / PV run on full, lane-dense vregs.
    Nkv_pad = _round_up(Nkv, _KV_PAD)
    if Nkv_pad != Nkv:
        y = jnp.pad(y, ((0, 0), (0, Nkv_pad - Nkv), (0, 0)))

    def weight_spec(block_shape):
        # Grid-invariant weights: single-buffer to avoid 2x VMEM for a block that
        # never changes (at D=2048 f32 the default double-buffering alone wastes 32-64 MiB).
        if single_buffer_weights:
            return pl.BlockSpec(block_shape, lambda *_: (0,) * len(block_shape),
                                pipeline_mode=pl.Buffered(1))
        return pl.BlockSpec(block_shape, lambda *_: (0,) * len(block_shape))

    # ---- kernel 1: kv projection ---------------------------------------------------
    tkv = _pick_kv_tile(Nkv_pad, D, w_bytes, act_bytes, kv_bytes, vmem_limit,
                        single_buffer_weights)
    k, v = pl.pallas_call(
        functools.partial(_kv_proj_kernel, embed_dim=D, compute_dtype=compute_dtype),
        out_shape=(jax.ShapeDtypeStruct((B, Nkv_pad, D), compute_dtype),
                   jax.ShapeDtypeStruct((B, Nkv_pad, D), compute_dtype)),
        grid=(B, Nkv_pad // tkv),
        in_specs=[
            pl.BlockSpec((1, tkv, D), lambda b, j: (b, j, 0)),
            weight_spec((D, 2 * D)),
        ],
        out_specs=(
            pl.BlockSpec((1, tkv, D), lambda b, j: (b, j, 0)),
            pl.BlockSpec((1, tkv, D), lambda b, j: (b, j, 0)),
        ),
        compiler_params=cparams,
    )(y, wkv_b)

    # ---- kernel 2: q projection + attention ----------------------------------------
    tq = _pick_q_tile(Nq, D, Nkv_pad, w_bytes, act_bytes, act_bytes, kv_bytes,
                      vmem_limit, single_buffer_weights)
    Nq_pad = _round_up(Nq, tq)
    x_p = jnp.pad(x, ((0, 0), (0, Nq_pad - Nq), (0, 0))) if Nq_pad != Nq else x

    out_blocked = pl.pallas_call(
        functools.partial(_attn_kernel, n_heads=H, head_dim=dh, scale=scale,
                          compute_dtype=compute_dtype, kv_valid=Nkv, kv_total=Nkv_pad,
                          approx_recip=approx_softmax_recip),
        out_shape=jax.ShapeDtypeStruct((B, Nq_pad, D), x.dtype),
        grid=(B, Nq_pad // tq),
        in_specs=[
            pl.BlockSpec((1, tq, D), lambda b, i: (b, i, 0)),
            weight_spec((D, D)),
            pl.BlockSpec((1, Nkv_pad, D), lambda b, i: (b, 0, 0)),
            pl.BlockSpec((1, Nkv_pad, D), lambda b, i: (b, 0, 0)),
        ],
        out_specs=pl.BlockSpec((1, tq, D), lambda b, i: (b, i, 0)),
        compiler_params=cparams,
    )(x_p, wq_b, k, v)

    if Nq_pad != Nq:
        out_blocked = out_blocked[:, :Nq]

    # Head-blocked lanes (channel h*dh + d) -> PyTorch '(d h)' interleave (d*H + h).
    # TODO(synk): in a full model, fold this permutation into the next layer's input
    # channels once at init instead of paying an extra HBM round trip per call.
    out = out_blocked.reshape(B, Nq, H, dh)
    out = jnp.transpose(out, (0, 1, 3, 2)).reshape(B, Nq, D)
    return out


def _reference(x, y, wq, wkv, n_heads):
    """Pure-JAX replica of the PyTorch module, computed at HIGHEST matmul precision."""
    hp = jax.lax.Precision.HIGHEST
    B, Nq, D = x.shape
    H = n_heads
    dh = D // H
    q = jnp.einsum('bni,oi->bno', x, wq, precision=hp)
    kv = jnp.einsum('bni,oi->bno', y, wkv, precision=hp)
    k, v = kv[..., :D], kv[..., D:]

    def split_heads(t):  # 'bs n (d h) -> bs h n d'
        b, n, _ = t.shape
        return jnp.transpose(t.reshape(b, n, dh, H), (0, 3, 1, 2))

    qh, kh, vh = split_heads(q), split_heads(k), split_heads(v)
    s = jnp.einsum('bhnd,bhmd->bhnm', qh, kh, precision=hp) / math.sqrt(dh)
    p = jax.nn.softmax(s, axis=-1)
    o = jnp.einsum('bhnm,bhmd->bhnd', p, vh, precision=hp)
    # 'bs h n d -> bs n (d h)'
    return jnp.transpose(o, (0, 2, 3, 1)).reshape(B, Nq, D)


if __name__ == "__main__":
    B, Nq, Nkv, D, H = 2, 16, 8, 32, 4

    key = jax.random.PRNGKey(0)
    kx, ky, kwq, kwkv = jax.random.split(key, 4)

    x = jax.random.normal(kx, (B, Nq, D), dtype=jnp.float32)
    y = jax.random.normal(ky, (B, Nkv, D), dtype=jnp.float32)
    # PyTorch nn.Linear weight shapes: (out_features, in_features), no bias
    wq = jax.random.normal(kwq, (D, D), dtype=jnp.float32) * (1.0 / math.sqrt(D))
    wkv = jax.random.normal(kwkv, (2 * D, D), dtype=jnp.float32) * (1.0 / math.sqrt(D))

    ref = _reference(x, y, wq, wkv, n_heads=H)

    def run(**kw):
        try:
            return cross_attention(x, y, wq, wkv, n_heads=H,
                                   single_buffer_weights=True, **kw)
        except Exception:
            # Graceful fallback if this JAX build rejects per-operand buffer counts
            # (pl.Buffered(1)) on the grid-invariant weight BlockSpecs.
            return cross_attention(x, y, wq, wkv, n_heads=H,
                                   single_buffer_weights=False, **kw)

    # f32 path: tolerance covers MXU f32-pass rounding vs the HIGHEST-precision reference.
    out = jax.block_until_ready(run())
    assert out.shape == (B, Nq, D)
    assert jnp.allclose(out, ref, atol=2e-2, rtol=2e-2), "f32 kernel mismatch vs reference"

    # bf16 MXU-operand path (projections + QK^T/PV) with approx EUP reciprocal.
    out_bf16 = jax.block_until_ready(run(mxu_dtype=jnp.bfloat16,
                                         approx_softmax_recip=True))
    assert jnp.allclose(out_bf16, ref, atol=1e-1, rtol=1e-1), "bf16 kernel mismatch vs reference"

    print("KERNEL_OK")
</pallas_src>

<mosaic_0001>
module attributes {stable_mosaic.version = 11 : i64} {
  func.func @_kv_proj_kernel(%arg0: i32, %arg1: i32, %arg2: memref<1x128x32xf32, #tpu.memory_space<vmem>>, %arg3: memref<32x64xf32, #tpu.memory_space<vmem>>, %arg4: memref<1x128x32xf32, #tpu.memory_space<vmem>>, %arg5: memref<1x128x32xf32, #tpu.memory_space<vmem>>) attributes {dimension_semantics = [#tpu.dimension_semantics<parallel>, #tpu.dimension_semantics<parallel>], iteration_bounds = array<i64: 2, 1>, scalar_prefetch = 0 : i64, scratch_operands = 0 : i64, tpu.core_type = #tpu.core_type<tc>, window_params = [{transform_indices = @transform_0, window_bounds = array<i64: 1, 128, 32>}, {pipeline_mode = #tpu.pipeline_mode<synchronous>, transform_indices = @transform_1, window_bounds = array<i64: 32, 64>}, {transform_indices = @transform_2, window_bounds = array<i64: 1, 128, 32>}, {transform_indices = @transform_3, window_bounds = array<i64: 1, 128, 32>}]} {
    %c0 = arith.constant 0 : index
    %c0_0 = arith.constant 0 : index
    %c0_1 = arith.constant 0 : index
    %0 = vector.load %arg2[%c0, %c0_0, %c0_1] : memref<1x128x32xf32, #tpu.memory_space<vmem>>, vector<1x128x32xf32>
    %1 = vector.shape_cast %0 : vector<1x128x32xf32> to vector<128x32xf32>
    %c0_2 = arith.constant 0 : index
    %c0_3 = arith.constant 0 : index
    %2 = vector.load %arg3[%c0_2, %c0_3] : memref<32x64xf32, #tpu.memory_space<vmem>>, vector<32x64xf32>
    %cst = arith.constant dense<0.000000e+00> : vector<128x64xf32>
    %3 = tpu.matmul %1, %2, %cst {dimension_numbers = #tpu.dot_dimension_numbers<[1], [0], [0], [1], [0, 0, 1, 1], [], []>} : vector<128x32xf32>, vector<32x64xf32>, vector<128x64xf32> -> vector<128x64xf32>
    %4 = vector.extract_strided_slice %3 {offsets = [0, 0], sizes = [128, 32], strides = [1, 1]} : vector<128x64xf32> to vector<128x32xf32>
    %c0_4 = arith.constant 0 : index
    %c0_5 = arith.constant 0 : index
    %c0_6 = arith.constant 0 : index
    %5 = vector.load %arg4[%c0_4, %c0_5, %c0_6] : memref<1x128x32xf32, #tpu.memory_space<vmem>>, vector<1x128x32xf32>
    %6 = vector.shape_cast %5 : vector<1x128x32xf32> to vector<128x32xf32>
    %7 = vector.shape_cast %4 : vector<128x32xf32> to vector<1x128x32xf32>
    tpu.vector_store %arg4[%c0_4, %c0_5, %c0_6], %7 {strides = array<i32>} : memref<1x128x32xf32, #tpu.memory_space<vmem>>, vector<1x128x32xf32>,
    %8 = vector.extract_strided_slice %3 {offsets = [0, 32], sizes = [128, 32], strides = [1, 1]} : vector<128x64xf32> to vector<128x32xf32>
    %c0_7 = arith.constant 0 : index
    %c0_8 = arith.constant 0 : index
    %c0_9 = arith.constant 0 : index
    %9 = vector.load %arg5[%c0_7, %c0_8, %c0_9] : memref<1x128x32xf32, #tpu.memory_space<vmem>>, vector<1x128x32xf32>
    %10 = vector.shape_cast %9 : vector<1x128x32xf32> to vector<128x32xf32>
    %11 = vector.shape_cast %8 : vector<128x32xf32> to vector<1x128x32xf32>
    tpu.vector_store %arg5[%c0_7, %c0_8, %c0_9], %11 {strides = array<i32>} : memref<1x128x32xf32, #tpu.memory_space<vmem>>, vector<1x128x32xf32>,
    return
  }
  func.func @transform_0(%arg0: i32, %arg1: i32) -> (i32, i32, i32) {
    %c0_i32 = arith.constant 0 : i32
    %c0_i32_0 = arith.constant 0 : i32
    return %arg0, %arg1, %c0_i32 : i32, i32, i32
  }
  func.func @transform_1(%arg0: i32, %arg1: i32) -> (i32, i32) {
    %c0_i32 = arith.constant 0 : i32
    %c0_i32_0 = arith.constant 0 : i32
    %c0_i32_1 = arith.constant 0 : i32
    return %c0_i32, %c0_i32_0 : i32, i32
  }
  func.func @transform_2(%arg0: i32, %arg1: i32) -> (i32, i32, i32) {
    %c0_i32 = arith.constant 0 : i32
    %c0_i32_0 = arith.constant 0 : i32
    return %arg0, %arg1, %c0_i32 : i32, i32, i32
  }
  func.func @transform_3(%arg0: i32, %arg1: i32) -> (i32, i32, i32) {
    %c0_i32 = arith.constant 0 : i32
    %c0_i32_0 = arith.constant 0 : i32
    return %arg0, %arg1, %c0_i32 : i32, i32, i32
  }
}

module attributes {stable_mosaic.version = 11 : i64} {
  func.func @_kv_proj_kernel(%arg0: i32, %arg1: i32, %arg2: memref<1x128x32xf32, #tpu.memory_space<vmem>>, %arg3: memref<32x64xf32, #tpu.memory_space<vmem>>, %arg4: memref<1x128x32xf32, #tpu.memory_space<vmem>>, %arg5: memref<1x128x32xf32, #tpu.memory_space<vmem>>) attributes {dimension_semantics = [#tpu.dimension_semantics<parallel>, #tpu.dimension_semantics<parallel>], iteration_bounds = array<i64: 2, 1>, scalar_prefetch = 0 : i64, scratch_operands = 0 : i64, tpu.core_type = #tpu.core_type<tc>, window_params = [{transform_indices = @transform_0, window_bounds = array<i64: 1, 128, 32>}, {pipeline_mode = #tpu.pipeline_mode<synchronous>, transform_indices = @transform_1, window_bounds = array<i64: 32, 64>}, {transform_indices = @transform_2, window_bounds = array<i64: 1, 128, 32>}, {transform_indices = @transform_3, window_bounds = array<i64: 1, 128, 32>}]} {
    %c0 = arith.constant 0 : index
    %c0_0 = arith.constant 0 : index
    %c0_1 = arith.constant 0 : index
    %0 = vector.load %arg2[%c0, %c0_0, %c0_1] : memref<1x128x32xf32, #tpu.memory_space<vmem>>, vector<1x128x32xf32>
    %1 = vector.shape_cast %0 : vector<1x128x32xf32> to vector<128x32xf32>
    %c0_2 = arith.constant 0 : index
    %c0_3 = arith.constant 0 : index
    %2 = vector.load %arg3[%c0_2, %c0_3] : memref<32x64xf32, #tpu.memory_space<vmem>>, vector<32x64xf32>
    %cst = arith.constant dense<0.000000e+00> : vector<128x64xf32>
    %3 = tpu.matmul %1, %2, %cst {dimension_numbers = #tpu.dot_dimension_numbers<[1], [0], [0], [1], [0, 0, 1, 1], [], []>} : vector<128x32xf32>, vector<32x64xf32>, vector<128x64xf32> -> vector<128x64xf32>
    %4 = vector.extract_strided_slice %3 {offsets = [0, 0], sizes = [128, 32], strides = [1, 1]} : vector<128x64xf32> to vector<128x32xf32>
    %c0_4 = arith.constant 0 : index
    %c0_5 = arith.constant 0 : index
    %c0_6 = arith.constant 0 : index
    %5 = vector.load %arg4[%c0_4, %c0_5, %c0_6] : memref<1x128x32xf32, #tpu.memory_space<vmem>>, vector<1x128x32xf32>
    %6 = vector.shape_cast %5 : vector<1x128x32xf32> to vector<128x32xf32>
    %7 = vector.shape_cast %4 : vector<128x32xf32> to vector<1x128x32xf32>
    tpu.vector_store %arg4[%c0_4, %c0_5, %c0_6], %7 {strides = array<i32>} : memref<1x128x32xf32, #tpu.memory_space<vmem>>, vector<1x128x32xf32>,
    %8 = vector.extract_strided_slice %3 {offsets = [0, 32], sizes = [128, 32], strides = [1, 1]} : vector<128x64xf32> to vector<128x32xf32>
    %c0_7 = arith.constant 0 : index
    %c0_8 = arith.constant 0 : index
    %c0_9 = arith.constant 0 : index
    %9 = vector.load %arg5[%c0_7, %c0_8, %c0_9] : memref<1x128x32xf32, #tpu.memory_space<vmem>>, vector<1x128x32xf32>
    %10 = vector.shape_cast %9 : vector<1x128x32xf32> to vector<128x32xf32>
    %11 = vector.shape_cast %8 : vector<128x32xf32> to vector<1x128x32xf32>
    tpu.vector_store %arg5[%c0_7, %c0_8, %c0_9], %11 {strides = array<i32>} : memref<1x128x32xf32, #tpu.memory_space<vmem>>, vector<1x128x32xf32>,
    return
  }
  func.func @transform_0(%arg0: i32, %arg1: i32) -> (i32, i32, i32) {
    %c0_i32 = arith.constant 0 : i32
    %c0_i32_0 = arith.constant 0 : i32
    return %arg0, %arg1, %c0_i32 : i32, i32, i32
  }
  func.func @transform_1(%arg0: i32, %arg1: i32) -> (i32, i32) {
    %c0_i32 = arith.constant 0 : i32
    %c0_i32_0 = arith.constant 0 : i32
    %c0_i32_1 = arith.constant 0 : i32
    return %c0_i32, %c0_i32_0 : i32, i32
  }
  func.func @transform_2(%arg0: i32, %arg1: i32) -> (i32, i32, i32) {
    %c0_i32 = arith.constant 0 : i32
    %c0_i32_0 = arith.constant 0 : i32
    return %arg0, %arg1, %c0_i32 : i32, i32, i32
  }
  func.func @transform_3(%arg0: i32, %arg1: i32) -> (i32, i32, i32) {
    %c0_i32 = arith.constant 0 : i32
    %c0_i32_0 = arith.constant 0 : i32
    return %arg0, %arg1, %c0_i32 : i32, i32, i32
  }
}

</mosaic_0001>

<bundles_post_ra>
// kernel: tpu_custom_call.1
= control target key start
LH: loop header
LB: loop body
LE: loop exit
PB: predicated region body
PF: predicated region fallthrough
CT: control target
= control target key end

     0   :  { %s847_s12 = smov 0   ;;  %s849_s13 = smov 0   ;;  %s1018_s0 = inlined_call_operand.vmem [shape: f32[2,128,32], index: 0, kind: input, shape index: {}]   ;;  %s1019_s1 = inlined_call_operand.vmem [shape: f32[32,64], index: 1, kind: input, shape index: {}]   ;;  %s1020_s2 = inlined_call_operand.vmem [shape: f32[2,128,32], index: 2, kind: output, shape index: {0}]   ;;  %s1021_s3 = inlined_call_operand.vmem [shape: f32[2,128,32], index: 3, kind: output, shape index: {1}]  }
   0x1   :  { %s851_s14 = smov 0  }
   0x2 LB: > { %s26_s15 = sadd.s32 1, %s820_s13  ;;  %p685_p0 = scmp.ge.s32.totalorder %s824_s14, 1  ;;  %s824_s14 = sphi %s851_s14, %s14_s14   ;;  %s820_s13 = sphi %s849_s13, %s1023_s13   ;;  %s816_s12 = sphi %s847_s12, %s1022_s12  }
   0x3   : > { %p28_p1 = scmp.ge.s32.totalorder %s26_s15, 2  ;;  %p163_p2 = scmp.lt.s32.totalorder %s824_s14, 3 }
   0x5   : > { %s1025_s15 = smov (%p28_p1, %s26_s15), 0  ;;  %p164_p3 = pnand %p685_p0, %p163_p2 }
   0x6   : > { %v250_v0 = vld [vmem:[%s1019_s1] sm:$0xff] (!%p164_p3)  ;;  %v251_v1 = vld [vmem:[%s1019_s1 + $0x8] sm:$0xff] (!%p164_p3)  ;;  %v252_v2 = vld [vmem:[%s1019_s1 + $0x10] sm:$0xff] (!%p164_p3)  ;;  %p205_p4 = scmp.lt.s32.totalorder (!%p164_p3), %s816_s12, 1  ;;  %vm254_vm0 = vcmask (!%p164_p3), 261120   ;;  %s826_s4 = smov (!%p164_p3), 96  }
   0x7   : > { %167 = sbr.rel (%p164_p3) target bundleno = 376 (0x178), region = 28  ;;  %v765_v3 = vpack.c.bf16 (!%p164_p3), %v251_v1, %v250_v0  ;;  %v253_v4 = vld [vmem:[%s1019_s1 + $0x18] sm:$0xff] (!%p164_p3) }
   0x8   : > { %v769_v5 = vpack.c.bf16 (!%p164_p3), %v253_v4, %v252_v2 }
   0x9   : > { %766 = vmatprep.subr.bf16.mxu0 (!%p164_p3), %v765_v3  ;;  %773 = vmatprep.subr.bf16.mxu1 (!%p164_p3), %v765_v3 }
   0xa   : > { %768 = vmatpush3.bf16.msra.mxu0 (!%p164_p3), %v765_v3  ;;  %775 = vmatpush3.bf16.msra.mxu1 (!%p164_p3), %v765_v3 }
   0xb   : > { %770 = vmatprep.subr.bf16.mxu0 (!%p164_p3), %v769_v5  ;;  %774 = vmatprep.subr.bf16.mxu1 (!%p164_p3), %v769_v5 }
   0xe   : > { %s1027_s12 = smov (!%p205_p4, %s816_s12), 1  ;;  %772 = vmatpush3.bf16.msra.mxu0 %v769_v5  ;;  %776 = vmatpush3.bf16.msra.mxu1 %v769_v5 }
   0xf   : > { %s877_s24 = sshll.u32 %s1027_s12, 7 }
  0x10   : > { %s883_s27 = scalar_lea.vmem %s1018_s0, %s877_s24  ;;  %s921_s30 = scalar_lea.vmem %s1020_s2, %s877_s24 }
  0x11   : > { %v234_v6 = vld [vmem:[%s883_s27] sm:$0xff]  ;;  %v235_v8 = vld [vmem:[%s883_s27 + $0x8] sm:$0xff]  ;;  %v236_v10 = vld [vmem:[%s883_s27 + $0x10] sm:$0xff]  ;;  %s975_s7 = scalar_lea.vmem %s1021_s3, %s877_s24 }
  0x12   : > { %v242_v7 = vld [vmem:[%s883_s27 + $0x40] sm:$0xff]  ;;  %741 = vmatprep.mubr.msk.f32.mxu0 %vm254_vm0, %v234_v6  ;;  %v243_v9 = vld [vmem:[%s883_s27 + $0x48] sm:$0xff]  ;;  %v244_v11 = vld [vmem:[%s883_s27 + $0x50] sm:$0xff] }
  0x13   : > { %753 = vmatprep.mubr.msk.f32.mxu1 %vm254_vm0, %v242_v7  ;;  %742 = vmatmul.mubr.msk.f32.vlgmr.msra.gmra.mrb[0].mxu0 %vm254_vm0, %v235_v8  ;;  %v237_v12 = vld [vmem:[%s883_s27 + $0x18] sm:$0xff]  ;;  %v238_v14 = vld [vmem:[%s883_s27 + $0x20] sm:$0xff]  ;;  %v239_v16 = vld [vmem:[%s883_s27 + $0x28] sm:$0xff] }
  0x14   : > { %754 = vmatmul.mubr.msk.f32.vlgmr.msra.gmra.mrb[0].mxu1 %vm254_vm0, %v243_v9  ;;  %744 = vmatprep.mubr.msk.f32.mxu0 %vm254_vm0, %v236_v10  ;;  %v245_v13 = vld [vmem:[%s883_s27 + $0x58] sm:$0xff]  ;;  %v246_v15 = vld [vmem:[%s883_s27 + $0x60] sm:$0xff]  ;;  %v247_v17 = vld [vmem:[%s883_s27 + $0x68] sm:$0xff] }
  0x15   : > { %756 = vmatprep.mubr.msk.f32.mxu1 %vm254_vm0, %v244_v11  ;;  %v240_v18 = vld [vmem:[%s883_s27 + $0x30] sm:$0xff]  ;;  %v241_v20 = vld [vmem:[%s883_s27 + $0x38] sm:$0xff] }
  0x16   : > { %v248_v19 = vld [vmem:[%s883_s27 + $0x70] sm:$0xff]  ;;  %v249_v21 = vld [vmem:[%s883_s27 + $0x78] sm:$0xff] }
  0x17   : > { %745 = vmatmul.mubr.msk.f32.gmra.mrb[2].mxu0 %vm254_vm0, %v237_v12 }
  0x18   : > { %757 = vmatmul.mubr.msk.f32.gmra.mrb[2].mxu1 %vm254_vm0, %v245_v13  ;;  %747 = vmatprep.mubr.msk.f32.mxu0 %vm254_vm0, %v238_v14 }
  0x19   : > { %759 = vmatprep.mubr.msk.f32.mxu1 %vm254_vm0, %v246_v15 }
  0x1b   : > { %748 = vmatmul.mubr.msk.f32.gmra.mrb[4].mxu0 %vm254_vm0, %v239_v16 }
  0x1c   : > { %760 = vmatmul.mubr.msk.f32.gmra.mrb[4].mxu1 %vm254_vm0, %v247_v17  ;;  %750 = vmatprep.mubr.msk.f32.mxu0 %vm254_vm0, %v240_v18 }
  0x1d   : > { %762 = vmatprep.mubr.msk.f32.mxu1 %vm254_vm0, %v248_v19 }
  0x1f   : > { %751 = vmatmul.mubr.msk.f32.gmra.mrb[6].mxu0 %vm254_vm0, %v241_v20 }
  0x20   : > { %763 = vmatmul.mubr.msk.f32.gmra.mrb[6].mxu1 %vm254_vm0, %v249_v21 }
  0xe6   : > { %v743_v22 = vpop.f32.mrb[0].mxu0 }
  0xe7   : > { %v755_v23 = vpop.f32.mrb[0].mxu1  ;;  %449 = vst.msk [vmem:[%s921_s30 + $0x8] sm:$0xff] %vm254_vm0, %v743_v22  ;;  %482 = vrot.lane.b32.xlu0 %v743_v22, %s826_s4  ;;  %v369_v25 = vpop.f32.mrb[1].mxu0 }
  0xe8   : > { %457 = vst.msk [vmem:[%s921_s30 + $0x48] sm:$0xff] %vm254_vm0, %v755_v23  ;;  %498 = vrot.lane.b32.xlu1 %v755_v23, %s826_s4  ;;  %v409_v24 = vpop.f32.mrb[1].mxu1  ;;  %448 = vst.msk [vmem:[%s921_s30] sm:$0xff] %vm254_vm0, %v369_v25 }
  0xe9   : > { %456 = vst.msk [vmem:[%s921_s30 + $0x40] sm:$0xff] %vm254_vm0, %v409_v24 }
  0xea   : > { %v746_v26 = vpop.f32.mrb[2].mxu0 }
  0xeb   : > { %v758_v27 = vpop.f32.mrb[2].mxu1  ;;  %451 = vst.msk [vmem:[%s921_s30 + $0x18] sm:$0xff] %vm254_vm0, %v746_v26  ;;  %480 = vrot.lane.b32.xlu0 %v369_v25, %s826_s4  ;;  %v379_v28 = vpop.f32.mrb[3].mxu0 }
  0xec   : > { %486 = vrot.lane.b32.xlu1 %v746_v26, %s826_s4  ;;  %459 = vst.msk [vmem:[%s921_s30 + $0x58] sm:$0xff] %vm254_vm0, %v758_v27  ;;  %v419_v29 = vpop.f32.mrb[3].mxu1  ;;  %450 = vst.msk [vmem:[%s921_s30 + $0x10] sm:$0xff] %vm254_vm0, %v379_v28 }
  0xed   : > { %458 = vst.msk [vmem:[%s921_s30 + $0x50] sm:$0xff] %vm254_vm0, %v419_v29 }
  0xee   : > { %v749_v30 = vpop.f32.mrb[4].mxu0 }
  0xef   : > { %v761_v31 = vpop.f32.mrb[4].mxu1  ;;  %496 = vrot.lane.b32.xlu0 %v409_v24, %s826_s4  ;;  %453 = vst.msk [vmem:[%s921_s30 + $0x28] sm:$0xff] %vm254_vm0, %v749_v30  ;;  %v389_v32 = vpop.f32.mrb[5].mxu0 }
  0xf0   : > { %502 = vrot.lane.b32.xlu1 %v758_v27, %s826_s4  ;;  %461 = vst.msk [vmem:[%s921_s30 + $0x68] sm:$0xff] %vm254_vm0, %v761_v31  ;;  %v429_v33 = vpop.f32.mrb[5].mxu1  ;;  %452 = vst.msk [vmem:[%s921_s30 + $0x20] sm:$0xff] %vm254_vm0, %v389_v32 }
  0xf1   : > { %460 = vst.msk [vmem:[%s921_s30 + $0x60] sm:$0xff] %vm254_vm0, %v429_v33 }
  0xf2   : > { %v752_v34 = vpop.f32.mrb[6].mxu0 }
  0xf3   : > { %v764_v35 = vpop.f32.mrb[6].mxu1  ;;  %500 = vrot.lane.b32.xlu0 %v419_v29, %s826_s4  ;;  %455 = vst.msk [vmem:[%s921_s30 + $0x38] sm:$0xff] %vm254_vm0, %v752_v34  ;;  %v399_v36 = vpop.f32.mrb[7].mxu0 }
  0xf4   : > { %484 = vrot.lane.b32.xlu1 %v379_v28, %s826_s4  ;;  %463 = vst.msk [vmem:[%s921_s30 + $0x78] sm:$0xff] %vm254_vm0, %v764_v35  ;;  %v439_v37 = vpop.f32.mrb[7].mxu1  ;;  %454 = vst.msk [vmem:[%s921_s30 + $0x30] sm:$0xff] %vm254_vm0, %v399_v36 }
  0xf5   : > { %462 = vst.msk [vmem:[%s921_s30 + $0x70] sm:$0xff] %vm254_vm0, %v439_v37 }
  0xf7   : > { %488 = vrot.lane.b32.xlu0 %v389_v32, %s826_s4 }
  0xf8   : > { %490 = vrot.lane.b32.xlu1 %v749_v30, %s826_s4 }
  0xfb   : > { %504 = vrot.lane.b32.xlu0 %v429_v33, %s826_s4 }
  0xfc   : > { %506 = vrot.lane.b32.xlu1 %v761_v31, %s826_s4 }
  0xff   : > { %492 = vrot.lane.b32.xlu0 %v399_v36, %s826_s4 }
 0x100   : > { %494 = vrot.lane.b32.xlu1 %v752_v34, %s826_s4 }
 0x103   : > { %508 = vrot.lane.b32.xlu0 %v439_v37, %s826_s4 }
 0x104   : > { %510 = vrot.lane.b32.xlu1 %v764_v35, %s826_s4 }
 0x159   : > { %v483_v39 = vpop.permute.xlu0 %482 }
 0x15a   : > { %v499_v38 = vpop.permute.xlu1 %498  ;;  %529 = vst.msk [vmem:[%s975_s7 + $0x8] sm:$0xff] %vm254_vm0, %v483_v39 }
 0x15b   : > { %537 = vst.msk [vmem:[%s975_s7 + $0x48] sm:$0xff] %vm254_vm0, %v499_v38 }
 0x15d   : > { %v481_v40 = vpop.permute.xlu0 %480 }
 0x15e   : > { %v487_v41 = vpop.permute.xlu1 %486  ;;  %528 = vst.msk [vmem:[%s975_s7] sm:$0xff] %vm254_vm0, %v481_v40 }
 0x15f   : > { %531 = vst.msk [vmem:[%s975_s7 + $0x18] sm:$0xff] %vm254_vm0, %v487_v41 }
 0x161   : > { %v497_v42 = vpop.permute.xlu0 %496 }
 0x162   : > { %v503_v43 = vpop.permute.xlu1 %502  ;;  %536 = vst.msk [vmem:[%s975_s7 + $0x40] sm:$0xff] %vm254_vm0, %v497_v42 }
 0x163   : > { %539 = vst.msk [vmem:[%s975_s7 + $0x58] sm:$0xff] %vm254_vm0, %v503_v43 }
 0x165   : > { %v501_v44 = vpop.permute.xlu0 %500 }
 0x166   : > { %v485_v45 = vpop.permute.xlu1 %484  ;;  %538 = vst.msk [vmem:[%s975_s7 + $0x50] sm:$0xff] %vm254_vm0, %v501_v44 }
 0x167   : > { %530 = vst.msk [vmem:[%s975_s7 + $0x10] sm:$0xff] %vm254_vm0, %v485_v45 }
 0x169   : > { %v489_v47 = vpop.permute.xlu0 %488 }
 0x16a   : > { %v491_v46 = vpop.permute.xlu1 %490  ;;  %532 = vst.msk [vmem:[%s975_s7 + $0x20] sm:$0xff] %vm254_vm0, %v489_v47 }
 0x16b   : > { %533 = vst.msk [vmem:[%s975_s7 + $0x28] sm:$0xff] %vm254_vm0, %v491_v46 }
 0x16d   : > { %v505_v49 = vpop.permute.xlu0 %504 }
 0x16e   : > { %v507_v48 = vpop.permute.xlu1 %506  ;;  %540 = vst.msk [vmem:[%s975_s7 + $0x60] sm:$0xff] %vm254_vm0, %v505_v49 }
 0x16f   : > { %541 = vst.msk [vmem:[%s975_s7 + $0x68] sm:$0xff] %vm254_vm0, %v507_v48 }
 0x171   : > { %v493_v51 = vpop.permute.xlu0 %492 }
 0x172   : > { %v495_v50 = vpop.permute.xlu1 %494  ;;  %534 = vst.msk [vmem:[%s975_s7 + $0x30] sm:$0xff] %vm254_vm0, %v493_v51 }
 0x173   : > { %535 = vst.msk [vmem:[%s975_s7 + $0x38] sm:$0xff] %vm254_vm0, %v495_v50 }
 0x175   : > { %v509_v53 = vpop.permute.xlu0 %508 }
 0x176   : > { %v511_v52 = vpop.permute.xlu1 %510  ;;  %542 = vst.msk [vmem:[%s975_s7 + $0x70] sm:$0xff] %vm254_vm0, %v509_v53 }
 0x177   : > { %543 = vst.msk [vmem:[%s975_s7 + $0x78] sm:$0xff] %vm254_vm0, %v511_v52 }
 0x178 PF: > { %s14_s14 = sadd.s32 1, %s824_s14   ;;  %s1022_s12 = smov %s820_s13 }
 0x179   : > { %p11_p5 = scmp.ge.s32.totalorder %s14_s14, 4   ;;  %s1023_s13 = smov %s1025_s15 }
 0x17b   :  { %13 = sbr.rel (!%p11_p5) target bundleno = 2 (0x2), region = 70 }

// kernel: tpu_custom_call.1
= control target key start
LH: loop header
LB: loop body
LE: loop exit
PB: predicated region body
PF: predicated region fallthrough
CT: control target
= control target key end

     0   :  { %s847_s12 = smov 0   ;;  %s849_s13 = smov 0   ;;  %s1018_s0 = inlined_call_operand.vmem [shape: f32[2,128,32], index: 0, kind: input, shape index: {}]   ;;  %s1019_s1 = inlined_call_operand.vmem [shape: f32[32,64], index: 1, kind: input, shape index: {}]   ;;  %s1020_s2 = inlined_call_operand.vmem [shape: f32[2,128,32], index: 2, kind: output, shape index: {0}]   ;;  %s1021_s3 = inlined_call_operand.vmem [shape: f32[2,128,32], index: 3, kind: output, shape index: {1}]  }
   0x1   :  { %s851_s14 = smov 0  }
   0x2 LB: > { %s26_s15 = sadd.s32 1, %s820_s13  ;;  %p685_p0 = scmp.ge.s32.totalorder %s824_s14, 1  ;;  %s824_s14 = sphi %s851_s14, %s14_s14   ;;  %s820_s13 = sphi %s849_s13, %s1023_s13   ;;  %s816_s12 = sphi %s847_s12, %s1022_s12  }
   0x3   : > { %p28_p1 = scmp.ge.s32.totalorder %s26_s15, 2  ;;  %p163_p2 = scmp.lt.s32.totalorder %s824_s14, 3 }
   0x5   : > { %s1025_s15 = smov (%p28_p1, %s26_s15), 0  ;;  %p164_p3 = pnand %p685_p0, %p163_p2 }
   0x6   : > { %v250_v0 = vld [vmem:[%s1019_s1] sm:$0xff] (!%p164_p3)  ;;  %v251_v1 = vld [vmem:[%s1019_s1 + $0x8] sm:$0xff] (!%p164_p3)  ;;  %v252_v2 = vld [vmem:[%s1019_s1 + $0x10] sm:$0xff] (!%p164_p3)  ;;  %p205_p4 = scmp.lt.s32.totalorder (!%p164_p3), %s816_s12, 1  ;;  %vm254_vm0 = vcmask (!%p164_p3), 261120   ;;  %s826_s4 = smov (!%p164_p3), 96  }
   0x7   : > { %167 = sbr.rel (%p164_p3) target bundleno = 376 (0x178), region = 28  ;;  %v765_v3 = vpack.c.bf16 (!%p164_p3), %v251_v1, %v250_v0  ;;  %v253_v4 = vld [vmem:[%s1019_s1 + $0x18] sm:$0xff] (!%p164_p3) }
   0x8   : > { %v769_v5 = vpack.c.bf16 (!%p164_p3), %v253_v4, %v252_v2 }
   0x9   : > { %766 = vmatprep.subr.bf16.mxu0 (!%p164_p3), %v765_v3  ;;  %773 = vmatprep.subr.bf16.mxu1 (!%p164_p3), %v765_v3 }
   0xa   : > { %768 = vmatpush3.bf16.msra.mxu0 (!%p164_p3), %v765_v3  ;;  %775 = vmatpush3.bf16.msra.mxu1 (!%p164_p3), %v765_v3 }
   0xb   : > { %770 = vmatprep.subr.bf16.mxu0 (!%p164_p3), %v769_v5  ;;  %774 = vmatprep.subr.bf16.mxu1 (!%p164_p3), %v769_v5 }
   0xe   : > { %s1027_s12 = smov (!%p205_p4, %s816_s12), 1  ;;  %772 = vmatpush3.bf16.msra.mxu0 %v769_v5  ;;  %776 = vmatpush3.bf16.msra.mxu1 %v769_v5 }
   0xf   : > { %s877_s24 = sshll.u32 %s1027_s12, 7 }
  0x10   : > { %s883_s27 = scalar_lea.vmem %s1018_s0, %s877_s24  ;;  %s921_s30 = scalar_lea.vmem %s1020_s2, %s877_s24 }
  0x11   : > { %v234_v6 = vld [vmem:[%s883_s27] sm:$0xff]  ;;  %v235_v8 = vld [vmem:[%s883_s27 + $0x8] sm:$0xff]  ;;  %v236_v10 = vld [vmem:[%s883_s27 + $0x10] sm:$0xff]  ;;  %s975_s7 = scalar_lea.vmem %s1021_s3, %s877_s24 }
  0x12   : > { %v242_v7 = vld [vmem:[%s883_s27 + $0x40] sm:$0xff]  ;;  %741 = vmatprep.mubr.msk.f32.mxu0 %vm254_vm0, %v234_v6  ;;  %v243_v9 = vld [vmem:[%s883_s27 + $0x48] sm:$0xff]  ;;  %v244_v11 = vld [vmem:[%s883_s27 + $0x50] sm:$0xff] }
  0x13   : > { %753 = vmatprep.mubr.msk.f32.mxu1 %vm254_vm0, %v242_v7  ;;  %742 = vmatmul.mubr.msk.f32.vlgmr.msra.gmra.mrb[0].mxu0 %vm254_vm0, %v235_v8  ;;  %v237_v12 = vld [vmem:[%s883_s27 + $0x18] sm:$0xff]  ;;  %v238_v14 = vld [vmem:[%s883_s27 + $0x20] sm:$0xff]  ;;  %v239_v16 = vld [vmem:[%s883_s27 + $0x28] sm:$0xff] }
  0x14   : > { %754 = vmatmul.mubr.msk.f32.vlgmr.msra.gmra.mrb[0].mxu1 %vm254_vm0, %v243_v9  ;;  %744 = vmatprep.mubr.msk.f32.mxu0 %vm254_vm0, %v236_v10  ;;  %v245_v13 = vld [vmem:[%s883_s27 + $0x58] sm:$0xff]  ;;  %v246_v15 = vld [vmem:[%s883_s27 + $0x60] sm:$0xff]  ;;  %v247_v17 = vld [vmem:[%s883_s27 + $0x68] sm:$0xff] }
  0x15   : > { %756 = vmatprep.mubr.msk.f32.mxu1 %vm254_vm0, %v244_v11  ;;  %v240_v18 = vld [vmem:[%s883_s27 + $0x30] sm:$0xff]  ;;  %v241_v20 = vld [vmem:[%s883_s27 + $0x38] sm:$0xff] }
  0x16   : > { %v248_v19 = vld [vmem:[%s883_s27 + $0x70] sm:$0xff]  ;;  %v249_v21 = vld [vmem:[%s883_s27 + $0x78] sm:$0xff] }
  0x17   : > { %745 = vmatmul.mubr.msk.f32.gmra.mrb[2].mxu0 %vm254_vm0, %v237_v12 }
  0x18   : > { %757 = vmatmul.mubr.msk.f32.gmra.mrb[2].mxu1 %vm254_vm0, %v245_v13  ;;  %747 = vmatprep.mubr.msk.f32.mxu0 %vm254_vm0, %v238_v14 }
  0x19   : > { %759 = vmatprep.mubr.msk.f32.mxu1 %vm254_vm0, %v246_v15 }
  0x1b   : > { %748 = vmatmul.mubr.msk.f32.gmra.mrb[4].mxu0 %vm254_vm0, %v239_v16 }
  0x1c   : > { %760 = vmatmul.mubr.msk.f32.gmra.mrb[4].mxu1 %vm254_vm0, %v247_v17  ;;  %750 = vmatprep.mubr.msk.f32.mxu0 %vm254_vm0, %v240_v18 }
  0x1d   : > { %762 = vmatprep.mubr.msk.f32.mxu1 %vm254_vm0, %v248_v19 }
  0x1f   : > { %751 = vmatmul.mubr.msk.f32.gmra.mrb[6].mxu0 %vm254_vm0, %v241_v20 }
  0x20   : > { %763 = vmatmul.mubr.msk.f32.gmra.mrb[6].mxu1 %vm254_vm0, %v249_v21 }
  0xe6   : > { %v743_v22 = vpop.f32.mrb[0].mxu0 }
  0xe7   : > { %v755_v23 = vpop.f32.mrb[0].mxu1  ;;  %449 = vst.msk [vmem:[%s921_s30 + $0x8] sm:$0xff] %vm254_vm0, %v743_v22  ;;  %482 = vrot.lane.b32.xlu0 %v743_v22, %s826_s4  ;;  %v369_v25 = vpop.f32.mrb[1].mxu0 }
  0xe8   : > { %457 = vst.msk [vmem:[%s921_s30 + $0x48] sm:$0xff] %vm254_vm0, %v755_v23  ;;  %498 = vrot.lane.b32.xlu1 %v755_v23, %s826_s4  ;;  %v409_v24 = vpop.f32.mrb[1].mxu1  ;;  %448 = vst.msk [vmem:[%s921_s30] sm:$0xff] %vm254_vm0, %v369_v25 }
  0xe9   : > { %456 = vst.msk [vmem:[%s921_s30 + $0x40] sm:$0xff] %vm254_vm0, %v409_v24 }
  0xea   : > { %v746_v26 = vpop.f32.mrb[2].mxu0 }
  0xeb   : > { %v758_v27 = vpop.f32.mrb[2].mxu1  ;;  %451 = vst.msk [vmem:[%s921_s30 + $0x18] sm:$0xff] %vm254_vm0, %v746_v26  ;;  %480 = vrot.lane.b32.xlu0 %v369_v25, %s826_s4  ;;  %v379_v28 = vpop.f32.mrb[3].mxu0 }
  0xec   : > { %486 = vrot.lane.b32.xlu1 %v746_v26, %s826_s4  ;;  %459 = vst.msk [vmem:[%s921_s30 + $0x58] sm:$0xff] %vm254_vm0, %v758_v27  ;;  %v419_v29 = vpop.f32.mrb[3].mxu1  ;;  %450 = vst.msk [vmem:[%s921_s30 + $0x10] sm:$0xff] %vm254_vm0, %v379_v28 }
  0xed   : > { %458 = vst.msk [vmem:[%s921_s30 + $0x50] sm:$0xff] %vm254_vm0, %v419_v29 }
  0xee   : > { %v749_v30 = vpop.f32.mrb[4].mxu0 }
  0xef   : > { %v761_v31 = vpop.f32.mrb[4].mxu1  ;;  %496 = vrot.lane.b32.xlu0 %v409_v24, %s826_s4  ;;  %453 = vst.msk [vmem:[%s921_s30 + $0x28] sm:$0xff] %vm254_vm0, %v749_v30  ;;  %v389_v32 = vpop.f32.mrb[5].mxu0 }
  0xf0   : > { %502 = vrot.lane.b32.xlu1 %v758_v27, %s826_s4  ;;  %461 = vst.msk [vmem:[%s921_s30 + $0x68] sm:$0xff] %vm254_vm0, %v761_v31  ;;  %v429_v33 = vpop.f32.mrb[5].mxu1  ;;  %452 = vst.msk [vmem:[%s921_s30 + $0x20] sm:$0xff] %vm254_vm0, %v389_v32 }
  0xf1   : > { %460 = vst.msk [vmem:[%s921_s30 + $0x60] sm:$0xff] %vm254_vm0, %v429_v33 }
  0xf2   : > { %v752_v34 = vpop.f32.mrb[6].mxu0 }
  0xf3   : > { %v764_v35 = vpop.f32.mrb[6].mxu1  ;;  %500 = vrot.lane.b32.xlu0 %v419_v29, %s826_s4  ;;  %455 = vst.msk [vmem:[%s921_s30 + $0x38] sm:$0xff] %vm254_vm0, %v752_v34  ;;  %v399_v36 = vpop.f32.mrb[7].mxu0 }
  0xf4   : > { %484 = vrot.lane.b32.xlu1 %v379_v28, %s826_s4  ;;  %463 = vst.msk [vmem:[%s921_s30 + $0x78] sm:$0xff] %vm254_vm0, %v764_v35  ;;  %v439_v37 = vpop.f32.mrb[7].mxu1  ;;  %454 = vst.msk [vmem:[%s921_s30 + $0x30] sm:$0xff] %vm254_vm0, %v399_v36 }
  0xf5   : > { %462 = vst.msk [vmem:[%s921_s30 + $0x70] sm:$0xff] %vm254_vm0, %v439_v37 }
  0xf7   : > { %488 = vrot.lane.b32.xlu0 %v389_v32, %s826_s4 }
  0xf8   : > { %490 = vrot.lane.b32.xlu1 %v749_v30, %s826_s4 }
  0xfb   : > { %504 = vrot.lane.b32.xlu0 %v429_v33, %s826_s4 }
  0xfc   : > { %506 = vrot.lane.b32.xlu1 %v761_v31, %s826_s4 }
  0xff   : > { %492 = vrot.lane.b32.xlu0 %v399_v36, %s826_s4 }
 0x100   : > { %494 = vrot.lane.b32.xlu1 %v752_v34, %s826_s4 }
 0x103   : > { %508 = vrot.lane.b32.xlu0 %v439_v37, %s826_s4 }
 0x104   : > { %510 = vrot.lane.b32.xlu1 %v764_v35, %s826_s4 }
 0x159   : > { %v483_v39 = vpop.permute.xlu0 %482 }
 0x15a   : > { %v499_v38 = vpop.permute.xlu1 %498  ;;  %529 = vst.msk [vmem:[%s975_s7 + $0x8] sm:$0xff] %vm254_vm0, %v483_v39 }
 0x15b   : > { %537 = vst.msk [vmem:[%s975_s7 + $0x48] sm:$0xff] %vm254_vm0, %v499_v38 }
 0x15d   : > { %v481_v40 = vpop.permute.xlu0 %480 }
 0x15e   : > { %v487_v41 = vpop.permute.xlu1 %486  ;;  %528 = vst.msk [vmem:[%s975_s7] sm:$0xff] %vm254_vm0, %v481_v40 }
 0x15f   : > { %531 = vst.msk [vmem:[%s975_s7 + $0x18] sm:$0xff] %vm254_vm0, %v487_v41 }
 0x161   : > { %v497_v42 = vpop.permute.xlu0 %496 }
 0x162   : > { %v503_v43 = vpop.permute.xlu1 %502  ;;  %536 = vst.msk [vmem:[%s975_s7 + $0x40] sm:$0xff] %vm254_vm0, %v497_v42 }
 0x163   : > { %539 = vst.msk [vmem:[%s975_s7 + $0x58] sm:$0xff] %vm254_vm0, %v503_v43 }
 0x165   : > { %v501_v44 = vpop.permute.xlu0 %500 }
 0x166   : > { %v485_v45 = vpop.permute.xlu1 %484  ;;  %538 = vst.msk [vmem:[%s975_s7 + $0x50] sm:$0xff] %vm254_vm0, %v501_v44 }
 0x167   : > { %530 = vst.msk [vmem:[%s975_s7 + $0x10] sm:$0xff] %vm254_vm0, %v485_v45 }
 0x169   : > { %v489_v47 = vpop.permute.xlu0 %488 }
 0x16a   : > { %v491_v46 = vpop.permute.xlu1 %490  ;;  %532 = vst.msk [vmem:[%s975_s7 + $0x20] sm:$0xff] %vm254_vm0, %v489_v47 }
 0x16b   : > { %533 = vst.msk [vmem:[%s975_s7 + $0x28] sm:$0xff] %vm254_vm0, %v491_v46 }
 0x16d   : > { %v505_v49 = vpop.permute.xlu0 %504 }
 0x16e   : > { %v507_v48 = vpop.permute.xlu1 %506  ;;  %540 = vst.msk [vmem:[%s975_s7 + $0x60] sm:$0xff] %vm254_vm0, %v505_v49 }
 0x16f   : > { %541 = vst.msk [vmem:[%s975_s7 + $0x68] sm:$0xff] %vm254_vm0, %v507_v48 }
 0x171   : > { %v493_v51 = vpop.permute.xlu0 %492 }
 0x172   : > { %v495_v50 = vpop.permute.xlu1 %494  ;;  %534 = vst.msk [vmem:[%s975_s7 + $0x30] sm:$0xff] %vm254_vm0, %v493_v51 }
 0x173   : > { %535 = vst.msk [vmem:[%s975_s7 + $0x38] sm:$0xff] %vm254_vm0, %v495_v50 }
 0x175   : > { %v509_v53 = vpop.permute.xlu0 %508 }
 0x176   : > { %v511_v52 = vpop.permute.xlu1 %510  ;;  %542 = vst.msk [vmem:[%s975_s7 + $0x70] sm:$0xff] %vm254_vm0, %v509_v53 }
 0x177   : > { %543 = vst.msk [vmem:[%s975_s7 + $0x78] sm:$0xff] %vm254_vm0, %v511_v52 }
 0x178 PF: > { %s14_s14 = sadd.s32 1, %s824_s14   ;;  %s1022_s12 = smov %s820_s13 }
 0x179   : > { %p11_p5 = scmp.ge.s32.totalorder %s14_s14, 4   ;;  %s1023_s13 = smov %s1025_s15 }
 0x17b   :  { %13 = sbr.rel (!%p11_p5) target bundleno = 2 (0x2), region = 70 }

</bundles_post_ra>
